<compile_context>
chip_gen: v6e
topology: v6e:2x2x1
jax: 0.10.0
libtpu: 0.0.40
codegen_flags: <defaults>
</compile_context>

<pallas_src>
import functools

import jax
import jax.numpy as jnp
from jax.experimental import pallas as pl
from jax.experimental.pallas import tpu as pltpu


LANE = 128        # TPU lane width: output is lane-padded to a multiple of this.
MAX_TILE_B = 4096  # Row cap per block: f32 (4096,32) in + (4096,128) out is
                   # ~2.5 MiB per buffer (double-buffered ~5 MiB), well under
                   # the scoped-VMEM default on v5e/v6e/v7x.


# ----------------------------- Pallas kernel ------------------------------- #
def _lqr_forward_kernel(g_ref, negk0t_ref, u_ref):
    # u = g0 @ (-K0^T): sign, transpose and lane-padding are folded into the
    # weight, so the hot path is a single MXU push with a lane-dense store.
    u_ref[...] = jnp.dot(
        g_ref[...], negk0t_ref[...], preferred_element_type=jnp.float32
    ).astype(u_ref.dtype)


def koopman_lqr_forward_pallas(g0, neg_K0T_pad, u_dim, *, tile_b=None):
    """g0: (B, k); neg_K0T_pad: (k, n_pad) lane-padded -K[0].T  ->  (B, u_dim)."""
    B, k_rank = g0.shape
    n_pad = neg_K0T_pad.shape[1]

    if tile_b is None:
        tile_b = B if B <= MAX_TILE_B else MAX_TILE_B

    if tile_b >= B:
        # Single block covering the whole batch; block_shape equals the full
        # array dims, so no (8,128) alignment padding and no batch slice.
        tile_b = B
        num_tiles = 1
        b_total = B
        g0_in = g0
    else:
        # Large batch: tile at an 8-aligned row count.  B > MAX_TILE_B gives
        # num_tiles >= 2, letting Mosaic shard the grid across both v7x TCs.
        tile_b = max(8, (tile_b // 8) * 8)
        num_tiles = pl.cdiv(B, tile_b)
        b_total = num_tiles * tile_b
        g0_in = (
            g0
            if b_total == B
            else jnp.zeros((b_total, k_rank), g0.dtype).at[:B].set(g0)
        )

    cost = pl.CostEstimate(
        flops=2 * b_total * k_rank * n_pad,
        transcendentals=0,
        bytes_accessed=4 * (b_total * k_rank + k_rank * n_pad + b_total * n_pad),
    )

    out = pl.pallas_call(
        _lqr_forward_kernel,
        out_shape=jax.ShapeDtypeStruct((b_total, n_pad), g0.dtype),
        grid_spec=pltpu.PrefetchScalarGridSpec(
            num_scalar_prefetch=0,
            grid=(num_tiles,),
            in_specs=[
                pl.BlockSpec((tile_b, k_rank), lambda i: (i, 0)),
                # Constant index_map => the weight stays resident across steps.
                pl.BlockSpec((k_rank, n_pad), lambda i: (0, 0)),
            ],
            out_specs=pl.BlockSpec((tile_b, n_pad), lambda i: (i, 0)),
        ),
        compiler_params=pltpu.CompilerParams(
            dimension_semantics=(("parallel",) if num_tiles > 1 else ("arbitrary",))
        ),
        cost_estimate=cost,
    )(g0_in, neg_K0T_pad)

    # Lane slice is required (lane-dense output); batch slice only when padded.
    return out[:B, :u_dim]


# --------------------- Parameter setup / Riccati (glue) -------------------- #
def init_koopman_lqr_params(key, k, u_dim):
    """Deterministic synthetic init, matching nn.init.normal_(std=1) / zeros."""
    kg, ku = jax.random.split(key)
    return dict(
        g_affine=jax.random.normal(kg, (k, k), dtype=jnp.float32),
        u_affine=jax.random.normal(ku, (k, u_dim), dtype=jnp.float32),
        q_diag_log=jnp.zeros((k,), dtype=jnp.float32),
        r_diag_log=jnp.zeros((u_dim,), dtype=jnp.float32),
    )


def solve_lqr_neg_K0T_padded(params, T, n_pad):
    """Backward Riccati recursion (g_goal=None branch), Python-unrolled.

    Returns the lane-padded (k, n_pad) version of -K[0].T: sign flip,
    transpose and zero lane-padding are absorbed here (where K[0] is
    materialized anyway), so the kernel hot path is a single dot.

    NOTE: forward-unrolling T identical steps is equivalent to the torch
    reversed() loop only because A, B, Q, R are time-invariant here.
    """
    # TODO(synk): jnp.linalg.solve (tiny u_dim x u_dim dense solve) has no
    # clean Pallas equivalent; it stays in the JAX parameter-setup path.
    A = params["g_affine"]                       # (k, k)
    Bm = params["u_affine"]                      # (k, u)
    Q = jnp.diag(jnp.exp(params["q_diag_log"]))  # (k, k)
    R = jnp.diag(jnp.exp(params["r_diag_log"]))  # (u, u)
    At, Bt = A.T, Bm.T
    k_rank, u_dim = Bm.shape

    V = Q
    K0 = jnp.zeros((u_dim, k_rank), dtype=jnp.float32)
    for _ in range(T):                           # T static & small: unrolled
        Vuu = Bt @ V @ Bm + R                    # (u, u)
        Vuu_inv_Bt = jnp.linalg.solve(Vuu, Bt)   # (u, k)
        K0 = Vuu_inv_Bt @ V @ A                  # (u, k); last iter == i==0
        V = At @ V @ (A - Bm @ K0) + Q           # (k, k)

    # Lane-pad with zeros so the kernel output block is (tile_b, n_pad) dense.
    neg_K0T_pad = jnp.zeros((k_rank, n_pad), dtype=jnp.float32)
    neg_K0T_pad = neg_K0T_pad.at[:, :u_dim].set(-K0.T)
    return neg_K0T_pad


@functools.partial(jax.jit, static_argnames=("T",))
def koopman_lqr_forward(params, g0, T):
    """Full forward: Riccati setup (plain JAX) + Pallas lane-dense batched GEMM."""
    u_dim = params["u_affine"].shape[1]
    n_pad = max(LANE, ((u_dim + LANE - 1) // LANE) * LANE)
    neg_K0T_pad = solve_lqr_neg_K0T_padded(params, T, n_pad)
    # g_goal is None => k[0] is structurally zero, so no bias term is added.
    # TODO(synk): if g_goal support is added, k[0] must be recomputed per-call
    # and re-included as a kernel input (or folded into the weight pad lanes).
    return koopman_lqr_forward_pallas(g0, neg_K0T_pad, u_dim)


# --------------------------------- main ------------------------------------ #
if __name__ == "__main__":
    # Small shapes consistent with the module: rank k=32, horizon T=8,
    # control dim u_dim=8, batch=16.
    K_RANK, T, U_DIM, BATCH = 32, 8, 8, 16

    root = jax.random.PRNGKey(0)
    key_params, key_g0 = jax.random.split(root)

    params = init_koopman_lqr_params(key_params, K_RANK, U_DIM)
    g0 = jax.random.normal(key_g0, (BATCH, K_RANK), dtype=jnp.float32)

    u = koopman_lqr_forward(params, g0, T)
    u = jax.block_until_ready(u)

    # Reference check against plain JAX (same semantics as the torch module:
    # u = -K[0] @ g0 + k[0], with k[0] == 0 in the g_goal=None path).
    neg_K0T_pad_ref = solve_lqr_neg_K0T_padded(params, T, LANE)
    u_ref = g0 @ neg_K0T_pad_ref[:, :U_DIM]
    assert u.shape == (BATCH, U_DIM)
    assert jnp.allclose(u, u_ref, atol=1e-4, rtol=1e-4), "mismatch vs reference"

    print("KERNEL_OK")
</pallas_src>

<mosaic_0001>
module attributes {stable_mosaic.version = 11 : i64} {
  func.func @_lqr_forward_kernel(%arg0: i32, %arg1: memref<16x32xf32, #tpu.memory_space<vmem>>, %arg2: memref<32x128xf32, #tpu.memory_space<vmem>>, %arg3: memref<16x128xf32, #tpu.memory_space<vmem>>) attributes {dimension_semantics = [#tpu.dimension_semantics<arbitrary>], iteration_bounds = array<i64: 1>, scalar_prefetch = 0 : i64, scratch_operands = 0 : i64, tpu.core_type = #tpu.core_type<tc>, window_params = [{transform_indices = @transform_0, window_bounds = array<i64: 16, 32>}, {pipeline_mode = #tpu.pipeline_mode<synchronous>, transform_indices = @transform_1, window_bounds = array<i64: 32, 128>}, {transform_indices = @transform_2, window_bounds = array<i64: 16, 128>}]} {
    %c0 = arith.constant 0 : index
    %c0_0 = arith.constant 0 : index
    %0 = vector.load %arg1[%c0, %c0_0] : memref<16x32xf32, #tpu.memory_space<vmem>>, vector<16x32xf32>
    %c0_1 = arith.constant 0 : index
    %c0_2 = arith.constant 0 : index
    %1 = vector.load %arg2[%c0_1, %c0_2] : memref<32x128xf32, #tpu.memory_space<vmem>>, vector<32x128xf32>
    %cst = arith.constant dense<0.000000e+00> : vector<16x128xf32>
    %2 = tpu.matmul %0, %1, %cst {dimension_numbers = #tpu.dot_dimension_numbers<[1], [0], [0], [1], [0, 0, 1, 1], [], []>} : vector<16x32xf32>, vector<32x128xf32>, vector<16x128xf32> -> vector<16x128xf32>
    %c0_3 = arith.constant 0 : index
    %c0_4 = arith.constant 0 : index
    %3 = vector.load %arg3[%c0_3, %c0_4] : memref<16x128xf32, #tpu.memory_space<vmem>>, vector<16x128xf32>
    tpu.vector_store %arg3[%c0_3, %c0_4], %2 {strides = array<i32>} : memref<16x128xf32, #tpu.memory_space<vmem>>, vector<16x128xf32>,
    return
  }
  func.func @transform_0(%arg0: i32) -> (i32, i32) {
    %c0_i32 = arith.constant 0 : i32
    %c0_i32_0 = arith.constant 0 : i32
    return %arg0, %c0_i32 : i32, i32
  }
  func.func @transform_1(%arg0: i32) -> (i32, i32) {
    %c0_i32 = arith.constant 0 : i32
    %c0_i32_0 = arith.constant 0 : i32
    %c0_i32_1 = arith.constant 0 : i32
    return %c0_i32, %c0_i32_0 : i32, i32
  }
  func.func @transform_2(%arg0: i32) -> (i32, i32) {
    %c0_i32 = arith.constant 0 : i32
    %c0_i32_0 = arith.constant 0 : i32
    return %arg0, %c0_i32 : i32, i32
  }
}

</mosaic_0001>

<bundles_post_ra>
// kernel: custom-call.29
= control target key start
LH: loop header
LB: loop body
LE: loop exit
PB: predicated region body
PF: predicated region fallthrough
CT: control target
= control target key end

     0   :  { %5 = vsyncpa [#allocation4], 0  ;;  %s687_s12 = smov [#allocation0]   ;;  %s779_s0 = inlined_call_operand.vmem [shape: f32[8,8], index: 0, kind: input, shape index: {}]   ;;  %s780_s1 = inlined_call_operand.vmem [shape: f32[8,8], index: 1, kind: output, shape index: {0}]   ;;  %s781_s2 = inlined_call_operand.hbm [shape: s32[8], index: 2, kind: output, shape index: {1}]   ;;  %s782_s3 = inlined_call_operand.vmem [shape: s32[8], index: 3, kind: output, shape index: {2}]  }
   0x1   :  { %s691_s15 = smov %s779_s0  }
   0x2 LB: > { %v53_v0 = vld [vmem:[%s693_s15] sm:$0xff]  ;;  %s55_s15 = scalar_lea.vmem %s693_s15, 8   ;;  %s693_s15 = sphi %s691_s15, %s55_s15   ;;  %s689_s12 = sphi %s687_s12, %s56_s12  }
   0x3   : > { %54 = vst [vmem:[%s689_s12] sm:$0xff] %v53_v0  ;;  %s56_s12 = scalar_lea.vmem %s689_s12, 8   ;;  %p50_p0 = scmp.gt.s32.totalorder %s55_s15, %s779_s0 }
   0x4   :  { %v72_v2 = vlaneseq (%p50_p0)  ;;  %v707_v3 = vmov (%p50_p0), 0   ;;  %s739_s18 = smov (%p50_p0), 0  }
   0x5   :  { %52 = sbr.rel (!%p50_p0) target bundleno = 2 (0x2), region = 152  ;;  %71 = vst [vmem:[#allocation2] sm:$0x1] (%p50_p0), %v707_v3 }
   0x6   :  { %v736_v4 = vshrl.u32 (%p50_p0), %v72_v2, 7 }
   0x8   :  { %76 = vst [vmem:[#allocation7] sm:$0xff] (%p50_p0), %v736_v4 }
   0xa   :  { %v69_v1 = vld [vmem:[#allocation0] sm:$0xff] }
   0xb   :  { %70 = vst [vmem:[#allocation1] sm:$0xff] %v69_v1 }
   0xc LB: > { %v745_v7 = vstv %s697_s18  ;;  %s133_s0 = ssub.s32 128, %s697_s18  ;;  %v139_v37 = vand.u32 127, %v72_v2  ;;  %v142_v39 = vld [vmem:[#allocation2] ss:$0 sm:$0xff]  ;;  %s145_s19 = scalar_lea.vmem [#allocation1], %s697_s18  ;;  %s697_s18 = sphi %s739_s18, %s82_s18  }
   0xd   : > { %vm91_vm0 = vcmp.ge.s32.totalorder %v736_v4, %v745_v7  ;;  %s151_s21 = scalar_lea.vmem [#allocation7], %s697_s18  ;;  %vm171_vm13 = vcmp.gt.s32.totalorder %v736_v4, %v745_v7  ;;  %s82_s18 = sadd.s32 1, %s697_s18  }
   0xe   : > { %vm163_vm10 = vcmp.gt.s32.totalorder %v139_v37, %v745_v7  ;;  %vm140_vm11 = vcmp.eq.s32.totalorder %v139_v37, %v745_v7  ;;  %p79_p1 = scmp.ge.s32.totalorder %s82_s18, 8  }
   0xf   : > { %v153_v41 = vld [vmem:[%s151_s21] ss:$0 sm:$0xff]  ;;  %vm175_vm15 = vmand %vm171_vm13, %vm140_vm11  ;;  %s699_s26 = smov (%p79_p1), %s780_s1   ;;  %s703_s27 = smov (%p79_p1), [#allocation1]  }
  0x12   : > { %v87_v5 = vld [vmem:[#allocation1] sm:$0xff]  ;;  %v147_v40 = vld [vmem:[%s145_s19] ss:$0 sm:$0xff] }
  0x13   : > { %v88_v6 = vand.u32 2147483647, %v87_v5 }
  0x15   : > { %vm470_vm1 = vcmp.gt.f32.partialorder %v88_v6, -inf }
  0x16   : > { %vm95_vm2 = vmand %vm91_vm0, %vm470_vm1 }
  0x17   : > { %v96_v8 = vsel %vm95_vm2, %v736_v4, %v745_v7  ;;  %v97_v9 = vsel %vm95_vm2, %v88_v6, -inf }
  0x18   : > { %v98_v10 = vrot.slane %v97_v9, 1  ;;  %v99_v11 = vrot.slane %v96_v8, 1 }
  0x1a   : > { %vm100_vm3 = vcmp.ge.f32.partialorder %v98_v10, %v97_v9  ;;  %v103_v12 = vrot.slane %v98_v10, 1  ;;  %v104_v13 = vrot.slane %v99_v11, 1 }
  0x1b   : > { %v101_v14 = vsel %vm100_vm3, %v98_v10, %v97_v9  ;;  %v102_v15 = vsel %vm100_vm3, %v99_v11, %v96_v8 }
  0x1c   : > { %vm105_vm4 = vcmp.ge.f32.partialorder %v103_v12, %v101_v14  ;;  %v108_v16 = vrot.slane %v103_v12, 1  ;;  %v109_v17 = vrot.slane %v104_v13, 1 }
  0x1d   : > { %v106_v18 = vsel %vm105_vm4, %v103_v12, %v101_v14  ;;  %v107_v19 = vsel %vm105_vm4, %v104_v13, %v102_v15 }
  0x1e   : > { %vm110_vm5 = vcmp.ge.f32.partialorder %v108_v16, %v106_v18  ;;  %v113_v20 = vrot.slane %v108_v16, 1  ;;  %v114_v21 = vrot.slane %v109_v17, 1 }
  0x1f   : > { %v111_v22 = vsel %vm110_vm5, %v108_v16, %v106_v18  ;;  %v112_v23 = vsel %vm110_vm5, %v109_v17, %v107_v19 }
  0x20   : > { %vm115_vm6 = vcmp.ge.f32.partialorder %v113_v20, %v111_v22  ;;  %v118_v24 = vrot.slane %v113_v20, 1  ;;  %v119_v25 = vrot.slane %v114_v21, 1 }
  0x21   : > { %v116_v26 = vsel %vm115_vm6, %v113_v20, %v111_v22  ;;  %v117_v27 = vsel %vm115_vm6, %v114_v21, %v112_v23 }
  0x22   : > { %vm120_vm7 = vcmp.ge.f32.partialorder %v118_v24, %v116_v26  ;;  %v123_v28 = vrot.slane %v118_v24, 1  ;;  %v124_v29 = vrot.slane %v119_v25, 1 }
  0x23   : > { %v121_v30 = vsel %vm120_vm7, %v118_v24, %v116_v26  ;;  %v122_v31 = vsel %vm120_vm7, %v119_v25, %v117_v27 }
  0x24   : > { %vm125_vm8 = vcmp.ge.f32.partialorder %v123_v28, %v121_v30  ;;  %v128_v32 = vrot.slane %v123_v28, 1  ;;  %v129_v33 = vrot.slane %v124_v29, 1 }
  0x25   : > { %v126_v34 = vsel %vm125_vm8, %v123_v28, %v121_v30  ;;  %v127_v35 = vsel %vm125_vm8, %v124_v29, %v122_v31 }
  0x26   : > { %vm130_vm9 = vcmp.ge.f32.partialorder %v128_v32, %v126_v34 }
  0x27   : > { %v132_v36 = vsel %vm130_vm9, %v129_v33, %v127_v35 }
  0x28   : > { %134 = vrot.lane.b32.xlu0 %v132_v36, %s133_s0 }
  0x9a   : > { %v135_v38 = vpop.permute.xlu0 %134 }
  0x9b   : > { %478 = vpush %v135_v38 }
  0xcc   : > { %s479_s20 = spop %478 }
  0xcd   : > { %v141_v42 = vstv %s479_s20  ;;  %s146_s22 = scalar_lea.vmem [#allocation1], %s479_s20  ;;  %s152_s23 = scalar_lea.vmem [#allocation7], %s479_s20 }
  0xce   : > { %v148_v43 = vld [vmem:[%s146_s22] ss:$0 sm:$0xff]  ;;  %v143_v45 = vsel %vm140_vm11, %v141_v42, %v142_v39 }
  0xcf   : > { %v154_v44 = vld [vmem:[%s152_s23] ss:$0 sm:$0xff]  ;;  %149 = vst [vmem:[%s146_s22] sm:$0x1] %v147_v40  ;;  %vm157_vm12 = vcmp.ne.f32.partialorder %v148_v43, 0.0  ;;  %144 = vst [vmem:[#allocation2] sm:$0x1] %v143_v45 }
  0xd0   : > { %155 = vst [vmem:[%s152_s23] sm:$0x1] %v153_v41  ;;  %150 = vst [vmem:[%s145_s19] sm:$0x1] %v148_v43  ;;  %v164_v52 = vsel %vm163_vm10, %v148_v43, 0.0 }
  0xd1   : > { %156 = vst [vmem:[%s151_s21] sm:$0x1] %v154_v44  ;;  %vm158_vm14 = vmand %vm140_vm11, %vm157_vm12 }
  0xd2   : > { %v159_v46 = vsel %vm158_vm14, %v148_v43, 1.0 }
  0xd3   : > { %v172_v47 = vsel %vm171_vm13, %v159_v46, 1.0 }
  0xd4   : > { %603 = vrcp.f32 %v172_v47 }
  0xd6   :  { %v235_v57 = vld [vmem:[#allocation2] sm:$0x1] (%p79_p1) }
  0xd7   : > { %v168_v49 = vld [vmem:[#allocation1] sm:$0xff]  ;;  %238 = vst [vmem:[#allocation3] sm:$0x1] (%p79_p1), %v235_v57 }
  0xd8   :  { %v182_v56 = vld [vmem:[#allocation7] sm:$0xff] (%p79_p1) }
  0xe1   : > { %v604_v48 = vpop.eup %603 }
  0xe2   : > { %v174_v50 = vmul.f32 %v604_v48, %v168_v49 }
  0xe4   : > { %v176_v51 = vsel %vm175_vm15, %v174_v50, 0.0 }
  0xe5   : > { %177 = vadd.xlane.f32.xlu0 %v176_v51 }
 0x112   :  { %198 = vxpose.xlu0.b32.start.end [1/1] (short) (narrow) (%p79_p1), %v182_v56, 8 }
 0x16e   : > { %v178_v53 = vpop.xlane.xlu0 %177 }
 0x16f   : > { %v179_v54 = vmul.f32 %v178_v53, %v164_v52  ;;  %81 = sbr.rel (!%p79_p1) target bundleno = 12 (0xc), region = 163 }
 0x171   : > { %v180_v55 = vsub.f32 %v174_v50, %v179_v54 }
 0x173   : > { %181 = vst [vmem:[#allocation1] sm:$0xff] %v180_v55 }
 0x18e   :  { %v214_v58 = vpop.trf.xlu0 }
 0x18f   :  { %230 = vst [vmem:[#allocation5] sm:$0x1] %v214_v58 }
 0x196   :  { %v243_v59 = vld [vmem:[#allocation5] sm:$0x1] }
 0x197   :  { %246 = vst [vmem:[#allocation6] sm:$0x1] %v243_v59 }
 0x198 LB: > { %v294_v60 = vld [vmem:[%s705_s27] sm:$0xff]  ;;  %s296_s27 = scalar_lea.vmem %s705_s27, 8   ;;  %s705_s27 = sphi %s703_s27, %s296_s27   ;;  %s701_s26 = sphi %s699_s26, %s297_s26  }
 0x199   : > { %295 = vst [vmem:[%s701_s26] sm:$0xff] %v294_v60  ;;  %s297_s26 = scalar_lea.vmem %s701_s26, 8   ;;  %p291_p2 = scmp.gt.s32.totalorder %s296_s27, [#allocation1] }
 0x19a   :  { %s708_s28 = smov (%p291_p2), [#allocation3]  }
 0x19b   :  { %293 = sbr.rel (!%p291_p2) target bundleno = 408 (0x198), region = 185  ;;  %s315_s29 = sshll.u32 (%p291_p2), %s708_s28, 4  ;;  %s316_s29 = int_to_ptr.vmem [resolvable:$true] %s315_s29 }
 0x19c   :  { %s605_s1 = scalar_lea.vmem (%p291_p2), %s316_s29, 16  ;;  %s609_s5 = scalar_lea.vmem (%p291_p2), %s316_s29, 32 }
 0x19d   :  { %p606_p3 = scmp.ne.s32.totalorder (%p291_p2), %s316_s29, %s605_s1  ;;  %p610_p4 = scmp.lt.s32.totalorder (%p291_p2), %s316_s29, %s316_s29 }
 0x19e   :  { %v382_v61 = vld [vmem:[#allocation6] sm:$0x1] (%p291_p2)  ;;  %p611_p5 = scmp.lt.s32.totalorder (%p291_p2), %s609_s5, %s605_s1 }
 0x19f   :  { %383 = vst [vmem:[%s782_s3] sm:$0x1] (%p291_p2), %v382_v61 }
 0x1a0   :  { %p612_p6 = por %p611_p5, %p610_p4 }
 0x1a2   :  { %p613_p7 = pnand %p612_p6, %p606_p3 }
 0x1a4   :  { %616 = shalt.err (!%p613_p7)
}
 0x1a5   :  { %318 = dma.vmem_to_hbm [thread:$0]  %s316_s29, 16, %s781_s2, [#allocation4]  }
 0x1a6   :  { %685 = dma.done.wait [#allocation4], 16  }
 0x1a7   :  { %686 = vsyncadd [#allocation4], 4294967280 }
 0x1a8   :  { %389 = vsyncpa [#allocation4], 1 }

// kernel: custom-call.30
= control target key start
LH: loop header
LB: loop body
LE: loop exit
PB: predicated region body
PF: predicated region fallthrough
CT: control target
= control target key end

     0   :  { %v35_v0 = vlaneseq  ;;  %v181_v9 = vmov -1.0   ;;  %s216_s0 = inlined_call_operand.vmem [shape: f32[1,8,8], index: 0, kind: input, shape index: {}]   ;;  %s217_s1 = inlined_call_operand.vmem [shape: f32[1,8,8], index: 1, kind: output, shape index: {}]  }
   0x1   :  { %v30_v1 = vld [vmem:[%s216_s0] sm:$0xff] }
   0x2   :  { %v195_v2 = vand.u32 127, %v35_v0  ;;  %v39_v3 = vshrl.u32 %v35_v0, 7 }
   0x4   :  { %vm37_vm0 = vcmp.lt.s32.totalorder %v195_v2, 8  ;;  %vm41_vm1 = vcmp.eq.s32.totalorder %v39_v3, %v195_v2  ;;  %vm46_vm2 = vcmp.le.s32.totalorder %v39_v3, %v195_v2  ;;  %vm60_vm4 = vcmp.eq.s32.totalorder %v195_v2, 7 }
   0x5   :  { %v43_v4 = vsel %vm41_vm1, %v30_v1, 0.0  ;;  %vm47_vm3 = vmand %vm46_vm2, %vm37_vm0  ;;  %vm57_vm5 = vcmp.eq.s32.totalorder %v195_v2, %v39_v3  ;;  %v61_v10 = vsel %vm60_vm4, 1.0, %v181_v9  ;;  %vm68_vm6 = vcmp.eq.s32.totalorder %v195_v2, 6 }
   0x6   :  { %v48_v5 = vsel %vm47_vm3, %v30_v1, 0.0  ;;  %44 = vadd.xlane.f32.xlu0 %v43_v4  ;;  %v62_v11 = vsel %vm57_vm5, %v61_v10, 0.0  ;;  %vm78_vm7 = vcmp.eq.s32.totalorder %v195_v2, 5  ;;  %vm88_vm8 = vcmp.eq.s32.totalorder %v195_v2, 4 }
   0x7   :  { %vm98_vm9 = vcmp.eq.s32.totalorder %v195_v2, 3  ;;  %vm108_vm10 = vcmp.eq.s32.totalorder %v195_v2, 2  ;;  %vm118_vm11 = vcmp.eq.s32.totalorder %v195_v2, 1  ;;  %vm127_vm12 = vcmp.eq.s32.totalorder %v195_v2, 0 }
  0x8f   :  { %v200_v6 = vpop.xlane.xlu0 %44 }
  0x90   :  { %179 = vrcp.f32 %v200_v6  ;;  %vm134_vm13 = vweird.f32 %v200_v6 }
  0x9d   :  { %v180_v7 = vpop.eup %179 }
  0x9e   :  { %v50_v8 = vmul.f32 %v180_v7, %v48_v5 }
  0xa0   :  { %51 = vst [vmem:[#allocation2] sm:$0xff] %v50_v8 }
  0xa7   :  { %v64_v12 = vld [vmem:[#allocation2 + $0x6] ss:$0 sm:$0xff]  ;;  %v74_v15 = vld [vmem:[#allocation2 + $0x5] ss:$0 sm:$0xff]  ;;  %v84_v20 = vld [vmem:[#allocation2 + $0x4] ss:$0 sm:$0xff] }
  0xa8   :  { %v65_v13 = vxor.u32 2147483648, %v64_v12  ;;  %v75_v17 = vxor.u32 2147483648, %v74_v15  ;;  %v85_v22 = vxor.u32 2147483648, %v84_v20  ;;  %v94_v25 = vld [vmem:[#allocation2 + $0x3] ss:$0 sm:$0xff] }
  0xa9   :  { %v95_v27 = vxor.u32 2147483648, %v94_v25  ;;  %v104_v30 = vld [vmem:[#allocation2 + $0x2] ss:$0 sm:$0xff]  ;;  %v114_v35 = vld [vmem:[#allocation2 + $0x1] ss:$0 sm:$0xff] }
  0xaa   :  { %v69_v14 = vmul.f32 %v65_v13, %v62_v11  ;;  %v105_v32 = vxor.u32 2147483648, %v104_v30  ;;  %v115_v37 = vxor.u32 2147483648, %v114_v35  ;;  %v123_v40 = vld [vmem:[#allocation2] ss:$0 sm:$0xff] }
  0xab   :  { %v124_v42 = vxor.u32 2147483648, %v123_v40 }
  0xac   :  { %70 = vadd.xlane.f32.xlu0 %v69_v14 }
 0x135   :  { %v71_v16 = vpop.xlane.xlu0 %70 }
 0x136   :  { %v72_v18 = vsel %vm68_vm6, %v71_v16, %v62_v11 }
 0x137   :  { %v79_v19 = vmul.f32 %v75_v17, %v72_v18 }
 0x139   :  { %80 = vadd.xlane.f32.xlu1 %v79_v19 }
 0x1c2   :  { %v81_v21 = vpop.xlane.xlu1 %80 }
 0x1c3   :  { %v82_v23 = vsel %vm78_vm7, %v81_v21, %v72_v18 }
 0x1c4   :  { %v89_v24 = vmul.f32 %v85_v22, %v82_v23 }
 0x1c6   :  { %90 = vadd.xlane.f32.xlu1 %v89_v24 }
 0x24f   :  { %v91_v26 = vpop.xlane.xlu1 %90 }
 0x250   :  { %v92_v28 = vsel %vm88_vm8, %v91_v26, %v82_v23 }
 0x251   :  { %v99_v29 = vmul.f32 %v95_v27, %v92_v28 }
 0x253   :  { %100 = vadd.xlane.f32.xlu0 %v99_v29 }
 0x2dc   :  { %v101_v31 = vpop.xlane.xlu0 %100 }
 0x2dd   :  { %v102_v33 = vsel %vm98_vm9, %v101_v31, %v92_v28 }
 0x2de   :  { %v109_v34 = vmul.f32 %v105_v32, %v102_v33 }
 0x2e0   :  { %110 = vadd.xlane.f32.xlu1 %v109_v34 }
 0x369   :  { %v111_v36 = vpop.xlane.xlu1 %110 }
 0x36a   :  { %v112_v38 = vsel %vm108_vm10, %v111_v36, %v102_v33 }
 0x36b   :  { %v119_v39 = vmul.f32 %v115_v37, %v112_v38 }
 0x36d   :  { %120 = vadd.xlane.f32.xlu0 %v119_v39 }
 0x3f6   :  { %v121_v41 = vpop.xlane.xlu0 %120 }
 0x3f7   :  { %v122_v43 = vsel %vm118_vm11, %v121_v41, %v112_v38 }
 0x3f8   :  { %v128_v44 = vmul.f32 %v124_v42, %v122_v43 }
 0x3fa   :  { %129 = vadd.xlane.f32.xlu1 %v128_v44 }
 0x483   :  { %v130_v45 = vpop.xlane.xlu1 %129 }
 0x484   :  { %v131_v46 = vsel %vm127_vm12, %v130_v45, %v122_v43 }
 0x485   :  { %v133_v47 = vmul.f32 %v180_v7, %v131_v46 }
 0x487   :  { %v135_v48 = vsel %vm134_vm13, %v131_v46, %v133_v47 }
 0x488   :  { %166 = vst [vmem:[%s217_s1] sm:$0xff] %v135_v48 }

// kernel: custom-call.31
= control target key start
LH: loop header
LB: loop body
LE: loop exit
PB: predicated region body
PF: predicated region fallthrough
CT: control target
= control target key end

     0   :  { %v35_v0 = vlaneseq  ;;  %v182_v9 = vmov -1.0   ;;  %s217_s0 = inlined_call_operand.vmem [shape: f32[1,8,8], index: 0, kind: input, shape index: {}]   ;;  %s218_s1 = inlined_call_operand.vmem [shape: f32[1,8,8], index: 1, kind: output, shape index: {}]  }
   0x1   :  { %v30_v1 = vld [vmem:[%s217_s0] sm:$0xff] }
   0x2   :  { %v196_v2 = vand.u32 127, %v35_v0  ;;  %v39_v3 = vshrl.u32 %v35_v0, 7 }
   0x4   :  { %vm37_vm0 = vcmp.lt.s32.totalorder %v196_v2, 8  ;;  %vm41_vm1 = vcmp.eq.s32.totalorder %v39_v3, %v196_v2  ;;  %vm46_vm2 = vcmp.ge.s32.totalorder %v39_v3, %v196_v2  ;;  %vm60_vm4 = vcmp.eq.s32.totalorder %v196_v2, 0 }
   0x5   :  { %v43_v4 = vsel %vm41_vm1, %v30_v1, 0.0  ;;  %vm47_vm3 = vmand %vm46_vm2, %vm37_vm0  ;;  %vm57_vm5 = vcmp.eq.s32.totalorder %v196_v2, %v39_v3  ;;  %v61_v10 = vsel %vm60_vm4, 1.0, %v182_v9  ;;  %vm68_vm6 = vcmp.eq.s32.totalorder %v196_v2, 1 }
   0x6   :  { %v48_v5 = vsel %vm47_vm3, %v30_v1, 0.0  ;;  %44 = vadd.xlane.f32.xlu0 %v43_v4  ;;  %v62_v11 = vsel %vm57_vm5, %v61_v10, 0.0  ;;  %vm78_vm7 = vcmp.eq.s32.totalorder %v196_v2, 2  ;;  %vm88_vm8 = vcmp.eq.s32.totalorder %v196_v2, 3 }
   0x7   :  { %vm98_vm9 = vcmp.eq.s32.totalorder %v196_v2, 4  ;;  %vm108_vm10 = vcmp.eq.s32.totalorder %v196_v2, 5  ;;  %vm118_vm11 = vcmp.eq.s32.totalorder %v196_v2, 6  ;;  %vm128_vm12 = vcmp.eq.s32.totalorder %v196_v2, 7 }
  0x8f   :  { %v201_v6 = vpop.xlane.xlu0 %44 }
  0x90   :  { %180 = vrcp.f32 %v201_v6  ;;  %vm135_vm13 = vweird.f32 %v201_v6 }
  0x9d   :  { %v181_v7 = vpop.eup %180 }
  0x9e   :  { %v50_v8 = vmul.f32 %v181_v7, %v48_v5 }
  0xa0   :  { %51 = vst [vmem:[#allocation2] sm:$0xff] %v50_v8 }
  0xa7   :  { %v64_v12 = vld [vmem:[#allocation2 + $0x1] ss:$0 sm:$0xff]  ;;  %v74_v15 = vld [vmem:[#allocation2 + $0x2] ss:$0 sm:$0xff]  ;;  %v84_v20 = vld [vmem:[#allocation2 + $0x3] ss:$0 sm:$0xff] }
  0xa8   :  { %v65_v13 = vxor.u32 2147483648, %v64_v12  ;;  %v75_v17 = vxor.u32 2147483648, %v74_v15  ;;  %v85_v22 = vxor.u32 2147483648, %v84_v20  ;;  %v94_v25 = vld [vmem:[#allocation2 + $0x4] ss:$0 sm:$0xff] }
  0xa9   :  { %v95_v27 = vxor.u32 2147483648, %v94_v25  ;;  %v104_v30 = vld [vmem:[#allocation2 + $0x5] ss:$0 sm:$0xff]  ;;  %v114_v35 = vld [vmem:[#allocation2 + $0x6] ss:$0 sm:$0xff] }
  0xaa   :  { %v69_v14 = vmul.f32 %v65_v13, %v62_v11  ;;  %v105_v32 = vxor.u32 2147483648, %v104_v30  ;;  %v115_v37 = vxor.u32 2147483648, %v114_v35  ;;  %v124_v40 = vld [vmem:[#allocation2 + $0x7] ss:$0 sm:$0xff] }
  0xab   :  { %v125_v42 = vxor.u32 2147483648, %v124_v40 }
  0xac   :  { %70 = vadd.xlane.f32.xlu0 %v69_v14 }
 0x135   :  { %v71_v16 = vpop.xlane.xlu0 %70 }
 0x136   :  { %v72_v18 = vsel %vm68_vm6, %v71_v16, %v62_v11 }
 0x137   :  { %v79_v19 = vmul.f32 %v75_v17, %v72_v18 }
 0x139   :  { %80 = vadd.xlane.f32.xlu1 %v79_v19 }
 0x1c2   :  { %v81_v21 = vpop.xlane.xlu1 %80 }
 0x1c3   :  { %v82_v23 = vsel %vm78_vm7, %v81_v21, %v72_v18 }
 0x1c4   :  { %v89_v24 = vmul.f32 %v85_v22, %v82_v23 }
 0x1c6   :  { %90 = vadd.xlane.f32.xlu1 %v89_v24 }
 0x24f   :  { %v91_v26 = vpop.xlane.xlu1 %90 }
 0x250   :  { %v92_v28 = vsel %vm88_vm8, %v91_v26, %v82_v23 }
 0x251   :  { %v99_v29 = vmul.f32 %v95_v27, %v92_v28 }
 0x253   :  { %100 = vadd.xlane.f32.xlu0 %v99_v29 }
 0x2dc   :  { %v101_v31 = vpop.xlane.xlu0 %100 }
 0x2dd   :  { %v102_v33 = vsel %vm98_vm9, %v101_v31, %v92_v28 }
 0x2de   :  { %v109_v34 = vmul.f32 %v105_v32, %v102_v33 }
 0x2e0   :  { %110 = vadd.xlane.f32.xlu1 %v109_v34 }
 0x369   :  { %v111_v36 = vpop.xlane.xlu1 %110 }
 0x36a   :  { %v112_v38 = vsel %vm108_vm10, %v111_v36, %v102_v33 }
 0x36b   :  { %v119_v39 = vmul.f32 %v115_v37, %v112_v38 }
 0x36d   :  { %120 = vadd.xlane.f32.xlu0 %v119_v39 }
 0x3f6   :  { %v121_v41 = vpop.xlane.xlu0 %120 }
 0x3f7   :  { %v122_v43 = vsel %vm118_vm11, %v121_v41, %v112_v38 }
 0x3f8   :  { %v129_v44 = vmul.f32 %v125_v42, %v122_v43 }
 0x3fa   :  { %130 = vadd.xlane.f32.xlu1 %v129_v44 }
 0x483   :  { %v131_v45 = vpop.xlane.xlu1 %130 }
 0x484   :  { %v132_v46 = vsel %vm128_vm12, %v131_v45, %v122_v43 }
 0x485   :  { %v134_v47 = vmul.f32 %v181_v7, %v132_v46 }
 0x487   :  { %v136_v48 = vsel %vm135_vm13, %v132_v46, %v134_v47 }
 0x488   :  { %167 = vst [vmem:[%s218_s1] sm:$0xff] %v136_v48 }

// kernel: koopman_lqr_forward.1
= control target key start
LH: loop header
LB: loop body
LE: loop exit
PB: predicated region body
PF: predicated region fallthrough
CT: control target
= control target key end

     0   :  { %vm17_vm0 = vcmask 261120   ;;  %s165_s1 = inlined_call_operand.vmem [shape: f32[32,128], index: 1, kind: input, shape index: {}]   ;;  %s166_s0 = inlined_call_operand.vmem [shape: f32[16,32], index: 0, kind: input, shape index: {}]   ;;  %s167_s2 = inlined_call_operand.vmem [shape: f32[16,128], index: 2, kind: output, shape index: {}]  }
   0x1   :  { %v16_v0 = vld [vmem:[%s165_s1 + $0x18] sm:$0xff]  ;;  %v15_v1 = vld [vmem:[%s165_s1 + $0x10] sm:$0xff]  ;;  %v11_v2 = vld [vmem:[%s166_s0] sm:$0xff] }
   0x2   :  { %113 = vmatprep.subr.mxu0 %v16_v0  ;;  %v14_v3 = vld [vmem:[%s165_s1 + $0x8] sm:$0xff]  ;;  %121 = vmatprep.mubr.msk.f32.mxu0 %vm17_vm0, %v11_v2  ;;  %v13_v4 = vld [vmem:[%s165_s1] sm:$0xff] }
   0x3   :  { %114 = vmatpush3.msra.mxu0 %v16_v0  ;;  %v12_v5 = vld [vmem:[%s166_s0 + $0x8] sm:$0xff] }
   0x4   :  { %115 = vmatprep.subr.mxu0 %v15_v1 }
   0x5   :  { %116 = vmatpush3.msra.mxu0 %v15_v1 }
   0x6   :  { %117 = vmatprep.subr.mxu0 %v14_v3 }
   0x7   :  { %118 = vmatpush3.msra.mxu0 %v14_v3 }
   0x8   :  { %119 = vmatprep.subr.mxu0 %v13_v4 }
   0x9   :  { %120 = vmatpush3.msra.mxu0 %v13_v4 }
   0xa   :  { %122 = vmatmul.mubr.msk.f32.vlgmr.msra.gmra.mxu0 %vm17_vm0, %v12_v5 }
  0xca   :  { %v123_v6 = vpop.f32.mrf.mxu0 }
  0xcb   :  { %100 = vst [vmem:[%s167_s2 + $0x8] sm:$0xff] %v123_v6 }
  0xcc   :  { %v90_v7 = vpop.f32.mrf.mxu0 }
  0xcd   :  { %99 = vst [vmem:[%s167_s2] sm:$0xff] %v90_v7 }

</bundles_post_ra>
